<compile_context>
chip_gen: v6e
topology: v6e:2x2x1
jax: 0.10.0
libtpu: 0.0.40
codegen_flags: <defaults>
</compile_context>

<pallas_src>
import functools

import jax
import jax.numpy as jnp
from jax import lax
from jax.experimental import pallas as pl
from jax.experimental.pallas import tpu as pltpu


# ---------------------------------------------------------------------------
# Fused kernel: one batch block per grid step.
#   inputs : ht1 (Bt,H), hidden rows (Bt*L,H), mask (Bt,L,1),
#            [Wo;Wt] (2H,H), [bo;bt] (1,2H), Wz (H,H), bz (1,H)   (weights resident)
#   outputs: a (Bt,H), alpha packed (Bt, heads*L)  [layout (j, phi, lb), unscrambled in wrapper]
#   scratch: y_scr VMEM (Bt, L, 2H)  -- staged linear_one||linear_two result
# ---------------------------------------------------------------------------
def fused_kernel(ht1_ref, hidden_ref, mask_ref, w12_ref, b12_ref, wz_ref, bz_ref,
                 a_ref, alpha_ref, y_scr, *, heads):
    Bt, L, _ = mask_ref.shape
    H = hidden_ref.shape[-1]
    d = H // heads
    Lg = L // heads                       # positions per (head, phase) group

    dn = (((1,), (1,)), ((), ()))         # contract dim1 with dim1 (torch (out,in) weights)

    # ---- fused linear_one || linear_two projection of the whole hidden block (one MXU op) ----
    x2 = hidden_ref[...]                                                # (Bt*L, H)
    y2 = lax.dot_general(x2, w12_ref[...], dn,
                         preferred_element_type=jnp.float32) + b12_ref[...]   # (Bt*L, 2H)
    y_scr[...] = y2.reshape(Bt, L, 2 * H)   # stage in VMEM: [.., :H] = q1 source, [.., H:] = q2

    # ---- linear_zero projection of the last item (resident weight) ----
    q0 = lax.dot_general(ht1_ref[...], wz_ref[...], dn,
                         preferred_element_type=jnp.float32) + bz_ref[...]     # (Bt, H)

    # ---- phase-grouped masked values: vm[phi][b, lb, :] = lin2[b, lb*heads+phi, :] * mask ----
    # (strided sublane reads from VMEM; mask applied AFTER softmax, exactly as in torch)
    vm = []
    for phi in range(heads):
        v_rows = y_scr[:, pl.ds(phi, Lg, stride=heads), :]              # (Bt, Lg, 2H)
        m_rows = mask_ref[:, pl.ds(phi, Lg, stride=heads), :]           # (Bt, Lg, 1)
        vm.append(v_rows[:, :, H:] * m_rows)                            # (Bt, Lg, H)

    a_parts, alpha_parts = [], []
    for j in range(heads):                                              # static unroll (heads small)
        q0_j = q0[:, j * d:(j + 1) * d][:, None, :]                     # (Bt, 1, d)

        # scores for the odd-view positions l' = lb*heads + phi of query head j:
        #   q1_view[b, j, l', :] == lin1[b, j*Lg + lb, phi*d:(phi+1)*d]
        e_phi = []
        for phi in range(heads):
            q1_blk = y_scr[:, j * Lg:(j + 1) * Lg, phi * d:(phi + 1) * d]   # (Bt, Lg, d)
            s = jnp.einsum('bqd,bkd->bqk', q0_j, q1_blk,
                           preferred_element_type=jnp.float32)              # (Bt, 1, Lg)
            # softmax(2*sigmoid(s)) over all L positions; 2*sigmoid in (0,2) => no max-subtract
            e_phi.append(jnp.exp(2.0 * jax.nn.sigmoid(s)))
        denom = e_phi[0].sum(axis=-1, keepdims=True)
        for phi in range(1, heads):
            denom = denom + e_phi[phi].sum(axis=-1, keepdims=True)          # (Bt, 1, 1)
        inv = pl.reciprocal(denom)

        # TODO(synk): F.dropout(p=0.1) treated as eval-mode identity (inference path).

        acc = None
        for phi in range(heads):
            alpha_jp = e_phi[phi] * inv                                      # (Bt, 1, Lg)
            alpha_parts.append(alpha_jp)
            contrib = jnp.einsum('bql,bld->bqd', alpha_jp,
                                 vm[phi][:, :, j * d:(j + 1) * d],
                                 preferred_element_type=jnp.float32)         # (Bt, 1, d)
            acc = contrib if acc is None else acc + contrib
        a_parts.append(acc)

    # single lane-dense stores
    a_ref[...] = jnp.concatenate(a_parts, axis=-1)[:, 0, :]                  # (Bt, H)
    alpha_ref[...] = jnp.concatenate(alpha_parts, axis=-1)[:, 0, :]          # (Bt, heads*L)


# ---------------------------------------------------------------------------
# Wrapper: reproduces LastAttenion.forward (use_attn_conv=False, eval mode)
# ---------------------------------------------------------------------------
def last_attention_pallas(ht1, hidden, mask, params, heads,
                          *, batch_tile=128, vmem_limit_bytes=48 * 1024 * 1024):
    B, Lh1, H = ht1.shape
    L = hidden.shape[1]
    assert Lh1 == 1, "default (non-conv) path requires ht1.size(1) == 1"
    assert H % heads == 0
    assert L % heads == 0, "fused kernel requires heads | L"
    Lg = L // heads
    Wz, bz, Wo, bo, Wt, bt = params

    # pack linear_one/linear_two into one resident weight (single MXU matmul per block)
    w12 = jnp.concatenate([Wo, Wt], axis=0)                     # (2H, H) torch (out,in) layout
    b12 = jnp.concatenate([bo, bt], axis=0).reshape(1, 2 * H)

    ht1_2d = ht1.reshape(B, H)
    hidden_2d = hidden.reshape(B * L, H)                        # row-major; block = bb*L rows
    mask3 = mask.astype(jnp.float32).reshape(B, L, 1)

    # batch block: whole batch when small, else a multiple of 8 (ragged tail handled by Pallas)
    bb = B if B <= batch_tile else max(8, (batch_tile // 8) * 8)

    a, alpha_pk = pl.pallas_call(
        functools.partial(fused_kernel, heads=heads),
        out_shape=(jax.ShapeDtypeStruct((B, H), jnp.float32),
                   jax.ShapeDtypeStruct((B, heads * L), jnp.float32)),
        grid=(pl.cdiv(B, bb),),
        in_specs=[
            pl.BlockSpec((bb, H), lambda i: (i, 0)),            # ht1
            pl.BlockSpec((bb * L, H), lambda i: (i, 0)),        # hidden rows (batch-major)
            pl.BlockSpec((bb, L, 1), lambda i: (i, 0, 0)),      # mask
            pl.BlockSpec((2 * H, H), lambda i: (0, 0)),         # Wo||Wt   (resident)
            pl.BlockSpec((1, 2 * H), lambda i: (0, 0)),         # bo||bt   (resident)
            pl.BlockSpec((H, H), lambda i: (0, 0)),             # Wz       (resident)
            pl.BlockSpec((1, H), lambda i: (0, 0)),             # bz       (resident)
        ],
        out_specs=(pl.BlockSpec((bb, H), lambda i: (i, 0)),
                   pl.BlockSpec((bb, heads * L), lambda i: (i, 0))),
        scratch_shapes=[pltpu.VMEM((bb, L, 2 * H), jnp.float32)],
        compiler_params=pltpu.CompilerParams(
            dimension_semantics=("parallel",),                  # >=2 blocks -> v7x 2-TC split
            vmem_limit_bytes=vmem_limit_bytes),                 # ~48MiB: v7x-safe; raise on v5e/v6e
    )(ht1_2d, hidden_2d, mask3, w12, b12, Wz, bz.reshape(1, H))

    # unscramble alpha: kernel flat index = j*(heads*Lg) + phi*Lg + lb  ->  torch (B, L, heads)
    alpha = (alpha_pk.reshape(B, heads, heads, Lg)
                     .transpose(0, 3, 2, 1)
                     .reshape(B, L, heads))
    return a, alpha


# ---------------------------------------------------------------------------
# Pure-JAX reference (literal transcription of the torch forward, eval mode)
# ---------------------------------------------------------------------------
def last_attention_ref(ht1, hidden, mask, params, heads):
    B, Lh, H = ht1.shape
    L = hidden.shape[1]
    d = H // heads
    Wz, bz, Wo, bo, Wt, bt = params

    q0 = (ht1 @ Wz.T + bz).reshape(-1, Lh, d)
    q1 = (hidden @ Wo.T + bo).reshape(-1, L, d)
    q2 = (hidden @ Wt.T + bt).reshape(-1, L, d)

    alpha = jax.nn.sigmoid(jnp.matmul(q0, jnp.transpose(q1, (0, 2, 1))))
    alpha = alpha.reshape(-1, Lh * heads, L).transpose(0, 2, 1)
    alpha = jax.nn.softmax(2.0 * alpha, axis=1)

    prod = (alpha[..., None] * q2.reshape(B, -1, heads, d)).reshape(B, -1, H)
    a = jnp.sum(prod * mask.reshape(B, -1, 1).astype(jnp.float32), axis=1)
    return a, alpha


if __name__ == "__main__":
    B, L, H, heads = 2, 8, 32, 2   # hidden_size=32, heads=2, last item Lh=1
    key = jax.random.PRNGKey(0)
    k_ht, k_hid, k_m, kwz, kbz, kwo, kbo, kwt, kbt = jax.random.split(key, 9)

    ht1 = jax.random.normal(k_ht, (B, 1, H), dtype=jnp.float32)
    hidden = jax.random.normal(k_hid, (B, L, H), dtype=jnp.float32)
    mask = (jax.random.uniform(k_m, (B, L)) > 0.3).astype(jnp.float32)

    # reset_parameters(): every weight ~ Normal(std=0.1)
    params = (
        0.1 * jax.random.normal(kwz, (H, H), dtype=jnp.float32),  # linear_zero.weight
        0.1 * jax.random.normal(kbz, (H,), dtype=jnp.float32),    # linear_zero.bias
        0.1 * jax.random.normal(kwo, (H, H), dtype=jnp.float32),  # linear_one.weight
        0.1 * jax.random.normal(kbo, (H,), dtype=jnp.float32),    # linear_one.bias
        0.1 * jax.random.normal(kwt, (H, H), dtype=jnp.float32),  # linear_two.weight
        0.1 * jax.random.normal(kbt, (H,), dtype=jnp.float32),    # linear_two.bias
    )
    # linear_three/four/five are unused in forward() and therefore omitted.

    a, alpha = last_attention_pallas(ht1, hidden, mask, params, heads)
    jax.block_until_ready(a)
    jax.block_until_ready(alpha)

    a_ref, alpha_ref = last_attention_ref(ht1, hidden, mask, params, heads)
    assert a.shape == a_ref.shape and alpha.shape == alpha_ref.shape
    assert jnp.allclose(a, a_ref, rtol=1e-4, atol=1e-4)
    assert jnp.allclose(alpha, alpha_ref, rtol=1e-4, atol=1e-4)

    print("KERNEL_OK")
</pallas_src>

<mosaic_0001>
module attributes {stable_mosaic.version = 11 : i64} {
  func.func @fused_kernel(%arg0: i32, %arg1: memref<2x32xf32, #tpu.memory_space<vmem>>, %arg2: memref<16x32xf32, #tpu.memory_space<vmem>>, %arg3: memref<2x8x1xf32, #tpu.memory_space<vmem>>, %arg4: memref<64x32xf32, #tpu.memory_space<vmem>>, %arg5: memref<1x64xf32, #tpu.memory_space<vmem>>, %arg6: memref<32x32xf32, #tpu.memory_space<vmem>>, %arg7: memref<1x32xf32, #tpu.memory_space<vmem>>, %arg8: memref<2x32xf32, #tpu.memory_space<vmem>>, %arg9: memref<2x16xf32, #tpu.memory_space<vmem>>, %arg10: memref<2x8x64xf32, #tpu.memory_space<vmem>>) attributes {dimension_semantics = [#tpu.dimension_semantics<parallel>], iteration_bounds = array<i64: 1>, scalar_prefetch = 0 : i64, scratch_operands = 1 : i64, tpu.core_type = #tpu.core_type<tc>, window_params = [{transform_indices = @transform_0, window_bounds = array<i64: 2, 32>}, {transform_indices = @transform_1, window_bounds = array<i64: 16, 32>}, {transform_indices = @transform_2, window_bounds = array<i64: 2, 8, 1>}, {pipeline_mode = #tpu.pipeline_mode<synchronous>, transform_indices = @transform_3, window_bounds = array<i64: 64, 32>}, {pipeline_mode = #tpu.pipeline_mode<synchronous>, transform_indices = @transform_4, window_bounds = array<i64: 1, 64>}, {pipeline_mode = #tpu.pipeline_mode<synchronous>, transform_indices = @transform_5, window_bounds = array<i64: 32, 32>}, {pipeline_mode = #tpu.pipeline_mode<synchronous>, transform_indices = @transform_6, window_bounds = array<i64: 1, 32>}, {transform_indices = @transform_7, window_bounds = array<i64: 2, 32>}, {transform_indices = @transform_8, window_bounds = array<i64: 2, 16>}]} {
    %c0 = arith.constant 0 : index
    %c0_0 = arith.constant 0 : index
    %0 = vector.load %arg2[%c0, %c0_0] : memref<16x32xf32, #tpu.memory_space<vmem>>, vector<16x32xf32>
    %c0_1 = arith.constant 0 : index
    %c0_2 = arith.constant 0 : index
    %1 = vector.load %arg4[%c0_1, %c0_2] : memref<64x32xf32, #tpu.memory_space<vmem>>, vector<64x32xf32>
    %cst = arith.constant dense<0.000000e+00> : vector<16x64xf32>
    %2 = tpu.matmul %0, %1, %cst {dimension_numbers = #tpu.dot_dimension_numbers<[1], [1], [0], [0], [0, 0, 1, 0], [], []>} : vector<16x32xf32>, vector<64x32xf32>, vector<16x64xf32> -> vector<16x64xf32>
    %c0_3 = arith.constant 0 : index
    %c0_4 = arith.constant 0 : index
    %3 = vector.load %arg5[%c0_3, %c0_4] : memref<1x64xf32, #tpu.memory_space<vmem>>, vector<1x64xf32>
    %4 = vector.broadcast %3 : vector<1x64xf32> to vector<16x64xf32>
    %5 = arith.addf %2, %4 : vector<16x64xf32>
    %6 = vector.shape_cast %5 : vector<16x64xf32> to vector<2x8x64xf32>
    %c0_5 = arith.constant 0 : index
    %c0_6 = arith.constant 0 : index
    %c0_7 = arith.constant 0 : index
    %7 = vector.load %arg10[%c0_5, %c0_6, %c0_7] : memref<2x8x64xf32, #tpu.memory_space<vmem>>, vector<2x8x64xf32>
    tpu.vector_store %arg10[%c0_5, %c0_6, %c0_7], %6 {strides = array<i32>} : memref<2x8x64xf32, #tpu.memory_space<vmem>>, vector<2x8x64xf32>,
    %c0_8 = arith.constant 0 : index
    %c0_9 = arith.constant 0 : index
    %8 = vector.load %arg1[%c0_8, %c0_9] : memref<2x32xf32, #tpu.memory_space<vmem>>, vector<2x32xf32>
    %c0_10 = arith.constant 0 : index
    %c0_11 = arith.constant 0 : index
    %9 = vector.load %arg6[%c0_10, %c0_11] : memref<32x32xf32, #tpu.memory_space<vmem>>, vector<32x32xf32>
    %cst_12 = arith.constant dense<0.000000e+00> : vector<2x32xf32>
    %10 = tpu.matmul %8, %9, %cst_12 {dimension_numbers = #tpu.dot_dimension_numbers<[1], [1], [0], [0], [0, 0, 1, 0], [], []>} : vector<2x32xf32>, vector<32x32xf32>, vector<2x32xf32> -> vector<2x32xf32>
    %c0_13 = arith.constant 0 : index
    %c0_14 = arith.constant 0 : index
    %11 = vector.load %arg7[%c0_13, %c0_14] : memref<1x32xf32, #tpu.memory_space<vmem>>, vector<1x32xf32>
    %12 = vector.broadcast %11 : vector<1x32xf32> to vector<2x32xf32>
    %13 = arith.addf %10, %12 : vector<2x32xf32>
    %c0_15 = arith.constant 0 : index
    %c0_16 = arith.constant 0 : index
    %c0_17 = arith.constant 0 : index
    %14 = tpu.strided_load %arg10[%c0_15, %c0_16, %c0_17] {strides = array<i32: 1, 2, 1>} : memref<2x8x64xf32, #tpu.memory_space<vmem>>, vector<2x4x64xf32>
    %c0_18 = arith.constant 0 : index
    %c0_19 = arith.constant 0 : index
    %c0_20 = arith.constant 0 : index
    %15 = tpu.strided_load %arg3[%c0_18, %c0_19, %c0_20] {strides = array<i32: 1, 2, 1>} : memref<2x8x1xf32, #tpu.memory_space<vmem>>, vector<2x4x1xf32>
    %16 = vector.extract_strided_slice %14 {offsets = [0, 0, 32], sizes = [2, 4, 32], strides = [1, 1, 1]} : vector<2x4x64xf32> to vector<2x4x32xf32>
    %17 = vector.broadcast %15 : vector<2x4x1xf32> to vector<2x4x32xf32>
    %18 = arith.mulf %16, %17 : vector<2x4x32xf32>
    %c0_21 = arith.constant 0 : index
    %c1 = arith.constant 1 : index
    %c0_22 = arith.constant 0 : index
    %19 = tpu.strided_load %arg10[%c0_21, %c1, %c0_22] {strides = array<i32: 1, 2, 1>} : memref<2x8x64xf32, #tpu.memory_space<vmem>>, vector<2x4x64xf32>
    %c0_23 = arith.constant 0 : index
    %c1_24 = arith.constant 1 : index
    %c0_25 = arith.constant 0 : index
    %20 = tpu.strided_load %arg3[%c0_23, %c1_24, %c0_25] {strides = array<i32: 1, 2, 1>} : memref<2x8x1xf32, #tpu.memory_space<vmem>>, vector<2x4x1xf32>
    %21 = vector.extract_strided_slice %19 {offsets = [0, 0, 32], sizes = [2, 4, 32], strides = [1, 1, 1]} : vector<2x4x64xf32> to vector<2x4x32xf32>
    %22 = vector.broadcast %20 : vector<2x4x1xf32> to vector<2x4x32xf32>
    %23 = arith.mulf %21, %22 : vector<2x4x32xf32>
    %24 = vector.extract_strided_slice %13 {offsets = [0, 0], sizes = [2, 16], strides = [1, 1]} : vector<2x32xf32> to vector<2x16xf32>
    %25 = vector.shape_cast %24 : vector<2x16xf32> to vector<2x1x16xf32>
    %c0_26 = arith.constant 0 : index
    %c0_27 = arith.constant 0 : index
    %c0_28 = arith.constant 0 : index
    %26 = vector.load %arg10[%c0_26, %c0_27, %c0_28] : memref<2x8x64xf32, #tpu.memory_space<vmem>>, vector<2x4x16xf32>
    "tpu.trace_start"() <{level = 10 : i32, message = "bqd,bkd->bqk"}> : () -> ()
    %cst_29 = arith.constant dense<0.000000e+00> : vector<2x1x4xf32>
    %27 = tpu.matmul %25, %26, %cst_29 {dimension_numbers = #tpu.dot_dimension_numbers<[2], [2], [1], [1], [0, 0, 0, 1, 1, 1], [0], [0]>} : vector<2x1x16xf32>, vector<2x4x16xf32>, vector<2x1x4xf32> -> vector<2x1x4xf32>
    "tpu.trace_stop"() : () -> ()
    %28 = arith.negf %27 : vector<2x1x4xf32>
    %29 = math.exp %28 : vector<2x1x4xf32>
    %cst_30 = arith.constant 1.000000e+00 : f32
    %30 = vector.broadcast %cst_30 : f32 to vector<2x1x4xf32>
    %31 = arith.addf %30, %29 : vector<2x1x4xf32>
    %32 = arith.divf %30, %31 : vector<2x1x4xf32>
    %cst_31 = arith.constant 2.000000e+00 : f32
    %33 = vector.broadcast %cst_31 : f32 to vector<2x1x4xf32>
    %34 = arith.mulf %33, %32 : vector<2x1x4xf32>
    %35 = math.exp %34 : vector<2x1x4xf32>
    %c0_32 = arith.constant 0 : index
    %c0_33 = arith.constant 0 : index
    %c16 = arith.constant 16 : index
    %36 = vector.load %arg10[%c0_32, %c0_33, %c16] : memref<2x8x64xf32, #tpu.memory_space<vmem>>, vector<2x4x16xf32>
    "tpu.trace_start"() <{level = 10 : i32, message = "bqd,bkd->bqk"}> : () -> ()
    %cst_34 = arith.constant dense<0.000000e+00> : vector<2x1x4xf32>
    %37 = tpu.matmul %25, %36, %cst_34 {dimension_numbers = #tpu.dot_dimension_numbers<[2], [2], [1], [1], [0, 0, 0, 1, 1, 1], [0], [0]>} : vector<2x1x16xf32>, vector<2x4x16xf32>, vector<2x1x4xf32> -> vector<2x1x4xf32>
    "tpu.trace_stop"() : () -> ()
    %38 = arith.negf %37 : vector<2x1x4xf32>
    %39 = math.exp %38 : vector<2x1x4xf32>
    %cst_35 = arith.constant 1.000000e+00 : f32
    %40 = vector.broadcast %cst_35 : f32 to vector<2x1x4xf32>
    %41 = arith.addf %40, %39 : vector<2x1x4xf32>
    %42 = arith.divf %40, %41 : vector<2x1x4xf32>
    %cst_36 = arith.constant 2.000000e+00 : f32
    %43 = vector.broadcast %cst_36 : f32 to vector<2x1x4xf32>
    %44 = arith.mulf %43, %42 : vector<2x1x4xf32>
    %45 = math.exp %44 : vector<2x1x4xf32>
    %cst_37 = arith.constant dense<0.000000e+00> : vector<2x1xf32>
    %46 = vector.multi_reduction <add>, %35, %cst_37 [2] : vector<2x1x4xf32> to vector<2x1xf32>
    %47 = vector.shape_cast %46 : vector<2x1xf32> to vector<2x1x1xf32>
    %cst_38 = arith.constant dense<0.000000e+00> : vector<2x1xf32>
    %48 = vector.multi_reduction <add>, %45, %cst_38 [2] : vector<2x1x4xf32> to vector<2x1xf32>
    %49 = vector.shape_cast %48 : vector<2x1xf32> to vector<2x1x1xf32>
    %50 = arith.addf %47, %49 : vector<2x1x1xf32>
    %51 = tpu.reciprocal %50 : vector<2x1x1xf32> -> vector<2x1x1xf32>
    %52 = vector.broadcast %51 : vector<2x1x1xf32> to vector<2x1x4xf32>
    %53 = arith.mulf %35, %52 : vector<2x1x4xf32>
    %54 = vector.extract_strided_slice %18 {offsets = [0, 0, 0], sizes = [2, 4, 16], strides = [1, 1, 1]} : vector<2x4x32xf32> to vector<2x4x16xf32>
    "tpu.trace_start"() <{level = 10 : i32, message = "bql,bld->bqd"}> : () -> ()
    %cst_39 = arith.constant dense<0.000000e+00> : vector<2x1x16xf32>
    %55 = tpu.matmul %53, %54, %cst_39 {dimension_numbers = #tpu.dot_dimension_numbers<[2], [1], [1], [2], [0, 0, 0, 1, 1, 2], [0], [0]>} : vector<2x1x4xf32>, vector<2x4x16xf32>, vector<2x1x16xf32> -> vector<2x1x16xf32>
    "tpu.trace_stop"() : () -> ()
    %56 = vector.broadcast %51 : vector<2x1x1xf32> to vector<2x1x4xf32>
    %57 = arith.mulf %45, %56 : vector<2x1x4xf32>
    %58 = vector.extract_strided_slice %23 {offsets = [0, 0, 0], sizes = [2, 4, 16], strides = [1, 1, 1]} : vector<2x4x32xf32> to vector<2x4x16xf32>
    "tpu.trace_start"() <{level = 10 : i32, message = "bql,bld->bqd"}> : () -> ()
    %cst_40 = arith.constant dense<0.000000e+00> : vector<2x1x16xf32>
    %59 = tpu.matmul %57, %58, %cst_40 {dimension_numbers = #tpu.dot_dimension_numbers<[2], [1], [1], [2], [0, 0, 0, 1, 1, 2], [0], [0]>} : vector<2x1x4xf32>, vector<2x4x16xf32>, vector<2x1x16xf32> -> vector<2x1x16xf32>
    "tpu.trace_stop"() : () -> ()
    %60 = arith.addf %55, %59 : vector<2x1x16xf32>
    %61 = vector.extract_strided_slice %13 {offsets = [0, 16], sizes = [2, 16], strides = [1, 1]} : vector<2x32xf32> to vector<2x16xf32>
    %62 = vector.shape_cast %61 : vector<2x16xf32> to vector<2x1x16xf32>
    %c0_41 = arith.constant 0 : index
    %c4 = arith.constant 4 : index
    %c0_42 = arith.constant 0 : index
    %63 = vector.load %arg10[%c0_41, %c4, %c0_42] : memref<2x8x64xf32, #tpu.memory_space<vmem>>, vector<2x4x16xf32>
    "tpu.trace_start"() <{level = 10 : i32, message = "bqd,bkd->bqk"}> : () -> ()
    %cst_43 = arith.constant dense<0.000000e+00> : vector<2x1x4xf32>
    %64 = tpu.matmul %62, %63, %cst_43 {dimension_numbers = #tpu.dot_dimension_numbers<[2], [2], [1], [1], [0, 0, 0, 1, 1, 1], [0], [0]>} : vector<2x1x16xf32>, vector<2x4x16xf32>, vector<2x1x4xf32> -> vector<2x1x4xf32>
    "tpu.trace_stop"() : () -> ()
    %65 = arith.negf %64 : vector<2x1x4xf32>
    %66 = math.exp %65 : vector<2x1x4xf32>
    %cst_44 = arith.constant 1.000000e+00 : f32
    %67 = vector.broadcast %cst_44 : f32 to vector<2x1x4xf32>
    %68 = arith.addf %67, %66 : vector<2x1x4xf32>
    %69 = arith.divf %67, %68 : vector<2x1x4xf32>
    %cst_45 = arith.constant 2.000000e+00 : f32
    %70 = vector.broadcast %cst_45 : f32 to vector<2x1x4xf32>
    %71 = arith.mulf %70, %69 : vector<2x1x4xf32>
    %72 = math.exp %71 : vector<2x1x4xf32>
    %c0_46 = arith.constant 0 : index
    %c4_47 = arith.constant 4 : index
    %c16_48 = arith.constant 16 : index
    %73 = vector.load %arg10[%c0_46, %c4_47, %c16_48] : memref<2x8x64xf32, #tpu.memory_space<vmem>>, vector<2x4x16xf32>
    "tpu.trace_start"() <{level = 10 : i32, message = "bqd,bkd->bqk"}> : () -> ()
    %cst_49 = arith.constant dense<0.000000e+00> : vector<2x1x4xf32>
    %74 = tpu.matmul %62, %73, %cst_49 {dimension_numbers = #tpu.dot_dimension_numbers<[2], [2], [1], [1], [0, 0, 0, 1, 1, 1], [0], [0]>} : vector<2x1x16xf32>, vector<2x4x16xf32>, vector<2x1x4xf32> -> vector<2x1x4xf32>
    "tpu.trace_stop"() : () -> ()
    %75 = arith.negf %74 : vector<2x1x4xf32>
    %76 = math.exp %75 : vector<2x1x4xf32>
    %cst_50 = arith.constant 1.000000e+00 : f32
    %77 = vector.broadcast %cst_50 : f32 to vector<2x1x4xf32>
    %78 = arith.addf %77, %76 : vector<2x1x4xf32>
    %79 = arith.divf %77, %78 : vector<2x1x4xf32>
    %cst_51 = arith.constant 2.000000e+00 : f32
    %80 = vector.broadcast %cst_51 : f32 to vector<2x1x4xf32>
    %81 = arith.mulf %80, %79 : vector<2x1x4xf32>
    %82 = math.exp %81 : vector<2x1x4xf32>
    %cst_52 = arith.constant dense<0.000000e+00> : vector<2x1xf32>
    %83 = vector.multi_reduction <add>, %72, %cst_52 [2] : vector<2x1x4xf32> to vector<2x1xf32>
    %84 = vector.shape_cast %83 : vector<2x1xf32> to vector<2x1x1xf32>
    %cst_53 = arith.constant dense<0.000000e+00> : vector<2x1xf32>
    %85 = vector.multi_reduction <add>, %82, %cst_53 [2] : vector<2x1x4xf32> to vector<2x1xf32>
    %86 = vector.shape_cast %85 : vector<2x1xf32> to vector<2x1x1xf32>
    %87 = arith.addf %84, %86 : vector<2x1x1xf32>
    %88 = tpu.reciprocal %87 : vector<2x1x1xf32> -> vector<2x1x1xf32>
    %89 = vector.broadcast %88 : vector<2x1x1xf32> to vector<2x1x4xf32>
    %90 = arith.mulf %72, %89 : vector<2x1x4xf32>
    %91 = vector.extract_strided_slice %18 {offsets = [0, 0, 16], sizes = [2, 4, 16], strides = [1, 1, 1]} : vector<2x4x32xf32> to vector<2x4x16xf32>
    "tpu.trace_start"() <{level = 10 : i32, message = "bql,bld->bqd"}> : () -> ()
    %cst_54 = arith.constant dense<0.000000e+00> : vector<2x1x16xf32>
    %92 = tpu.matmul %90, %91, %cst_54 {dimension_numbers = #tpu.dot_dimension_numbers<[2], [1], [1], [2], [0, 0, 0, 1, 1, 2], [0], [0]>} : vector<2x1x4xf32>, vector<2x4x16xf32>, vector<2x1x16xf32> -> vector<2x1x16xf32>
    "tpu.trace_stop"() : () -> ()
    %93 = vector.broadcast %88 : vector<2x1x1xf32> to vector<2x1x4xf32>
    %94 = arith.mulf %82, %93 : vector<2x1x4xf32>
    %95 = vector.extract_strided_slice %23 {offsets = [0, 0, 16], sizes = [2, 4, 16], strides = [1, 1, 1]} : vector<2x4x32xf32> to vector<2x4x16xf32>
    "tpu.trace_start"() <{level = 10 : i32, message = "bql,bld->bqd"}> : () -> ()
    %cst_55 = arith.constant dense<0.000000e+00> : vector<2x1x16xf32>
    %96 = tpu.matmul %94, %95, %cst_55 {dimension_numbers = #tpu.dot_dimension_numbers<[2], [1], [1], [2], [0, 0, 0, 1, 1, 2], [0], [0]>} : vector<2x1x4xf32>, vector<2x4x16xf32>, vector<2x1x16xf32> -> vector<2x1x16xf32>
    "tpu.trace_stop"() : () -> ()
    %97 = arith.addf %92, %96 : vector<2x1x16xf32>
    %98 = tpu.concatenate %60, %97 in 2 : vector<2x1x16xf32>, vector<2x1x16xf32> -> vector<2x1x32xf32>
    %99 = vector.shape_cast %98 : vector<2x1x32xf32> to vector<2x32xf32>
    %c0_56 = arith.constant 0 : index
    %c0_57 = arith.constant 0 : index
    %100 = vector.load %arg8[%c0_56, %c0_57] : memref<2x32xf32, #tpu.memory_space<vmem>>, vector<2x32xf32>
    tpu.vector_store %arg8[%c0_56, %c0_57], %99 {strides = array<i32>} : memref<2x32xf32, #tpu.memory_space<vmem>>, vector<2x32xf32>,
    %101 = tpu.concatenate %53, %57, %90, %94 in 2 : vector<2x1x4xf32>, vector<2x1x4xf32>, vector<2x1x4xf32>, vector<2x1x4xf32> -> vector<2x1x16xf32>
    %102 = vector.shape_cast %101 : vector<2x1x16xf32> to vector<2x16xf32>
    %c0_58 = arith.constant 0 : index
    %c0_59 = arith.constant 0 : index
    %103 = vector.load %arg9[%c0_58, %c0_59] : memref<2x16xf32, #tpu.memory_space<vmem>>, vector<2x16xf32>
    tpu.vector_store %arg9[%c0_58, %c0_59], %102 {strides = array<i32>} : memref<2x16xf32, #tpu.memory_space<vmem>>, vector<2x16xf32>,
    return
  }
  func.func @transform_0(%arg0: i32) -> (i32, i32) {
    %c0_i32 = arith.constant 0 : i32
    %c0_i32_0 = arith.constant 0 : i32
    return %arg0, %c0_i32 : i32, i32
  }
  func.func @transform_1(%arg0: i32) -> (i32, i32) {
    %c0_i32 = arith.constant 0 : i32
    %c0_i32_0 = arith.constant 0 : i32
    return %arg0, %c0_i32 : i32, i32
  }
  func.func @transform_2(%arg0: i32) -> (i32, i32, i32) {
    %c0_i32 = arith.constant 0 : i32
    %c0_i32_0 = arith.constant 0 : i32
    %c0_i32_1 = arith.constant 0 : i32
    return %arg0, %c0_i32, %c0_i32_0 : i32, i32, i32
  }
  func.func @transform_3(%arg0: i32) -> (i32, i32) {
    %c0_i32 = arith.constant 0 : i32
    %c0_i32_0 = arith.constant 0 : i32
    %c0_i32_1 = arith.constant 0 : i32
    return %c0_i32, %c0_i32_0 : i32, i32
  }
  func.func @transform_4(%arg0: i32) -> (i32, i32) {
    %c0_i32 = arith.constant 0 : i32
    %c0_i32_0 = arith.constant 0 : i32
    %c0_i32_1 = arith.constant 0 : i32
    return %c0_i32, %c0_i32_0 : i32, i32
  }
  func.func @transform_5(%arg0: i32) -> (i32, i32) {
    %c0_i32 = arith.constant 0 : i32
    %c0_i32_0 = arith.constant 0 : i32
    %c0_i32_1 = arith.constant 0 : i32
    return %c0_i32, %c0_i32_0 : i32, i32
  }
  func.func @transform_6(%arg0: i32) -> (i32, i32) {
    %c0_i32 = arith.constant 0 : i32
    %c0_i32_0 = arith.constant 0 : i32
    %c0_i32_1 = arith.constant 0 : i32
    return %c0_i32, %c0_i32_0 : i32, i32
  }
  func.func @transform_7(%arg0: i32) -> (i32, i32) {
    %c0_i32 = arith.constant 0 : i32
    %c0_i32_0 = arith.constant 0 : i32
    return %arg0, %c0_i32 : i32, i32
  }
  func.func @transform_8(%arg0: i32) -> (i32, i32) {
    %c0_i32 = arith.constant 0 : i32
    %c0_i32_0 = arith.constant 0 : i32
    return %arg0, %c0_i32 : i32, i32
  }
}

</mosaic_0001>

<bundles_post_ra>
// kernel: tpu_custom_call.1
= control target key start
LH: loop header
LB: loop body
LE: loop exit
PB: predicated region body
PF: predicated region fallthrough
CT: control target
= control target key end

     0   :  { %14 = vsyncpa [#allocation4], 0  ;;  %vm47_vm0 = vcmask 261120   ;;  %v2081_v2 = vmov 0.0   ;;  %vm2082_vm1 = vmmov 0   ;;  %v2083_v7 = vmov 0   ;;  %s2397_s0 = inlined_call_operand.vmem [shape: f32[2,32], index: 0, kind: input, shape index: {}]   ;;  %s2398_s1 = inlined_call_operand.vmem [shape: f32[16,32], index: 1, kind: input, shape index: {}]   ;;  %s2399_s2 = inlined_call_operand.vmem [shape: f32[2,8,1], index: 2, kind: input, shape index: {}]   ;;  %s2400_s3 = inlined_call_operand.vmem [shape: f32[64,32], index: 3, kind: input, shape index: {}]   ;;  %s2401_s4 = inlined_call_operand.vmem [shape: f32[1,64], index: 4, kind: input, shape index: {}]   ;;  %s2402_s5 = inlined_call_operand.vmem [shape: f32[32,32], index: 5, kind: input, shape index: {}]   ;;  %s2403_s6 = inlined_call_operand.vmem [shape: f32[1,32], index: 6, kind: input, shape index: {}]   ;;  %s2404_s7 = inlined_call_operand.hbm [shape: f32[2,32], index: 7, kind: output, shape index: {0}]   ;;  %s2405_s8 = inlined_call_operand.hbm [shape: f32[2,16], index: 8, kind: output, shape index: {1}]  }
   0x1   :  { %v39_v0 = vld [vmem:[%s2400_s3 + $0x38] sm:$0xff]  ;;  %v38_v1 = vld [vmem:[%s2400_s3 + $0x30] sm:$0xff]  ;;  %1875 = vmatprep.subr.mxu1 %v2081_v2  ;;  %1883 = vmatprep.mubr.msk.f32.mxu1 %vm2082_vm1, %v2081_v2  ;;  %v30_v4 = vld [vmem:[%s2398_s1] sm:$0xff] }
   0x2   :  { %1856 = vmatprep.subr.msk.mxu0 %vm47_vm0, %v39_v0  ;;  %v160_v3 = vld [vmem:[%s2402_s5 + $0x18] sm:$0xff]  ;;  %v37_v5 = vld [vmem:[%s2400_s3 + $0x28] sm:$0xff]  ;;  %1872 = vmatprep.mubr.msk.f32.mxu0 %vm47_vm0, %v30_v4  ;;  %v159_v6 = vld [vmem:[%s2402_s5 + $0x10] sm:$0xff] }
   0x3   :  { %1857 = vmatpush3.xpose.msk.msra.mxu0 %vm47_vm0, %v39_v0  ;;  %1876 = vmatpush3.xpose.msk.msra.mxu1 %vm47_vm0, %v160_v3  ;;  %v1768_v8 = vld [vmem:[%s2399_s2 + $0x9] ss:$2 sm:$0xf] }
   0x4   :  { %1858 = vmatprep.subr.msk.mxu0 %vm47_vm0, %v38_v1  ;;  %1877 = vmatprep.subr.mxu1 %v2081_v2 }
   0x5   :  { %1979 = vset.pattern.permute.xlu1 %v2083_v7  ;;  %1980 = vset.pattern.permute.xlu0 %v2083_v7 }
   0x6   :  { %286 = vperm.xlu1 %1979, %v1768_v8  }
   0x7   :  { %1859 = vmatpush3.xpose.msk.msra.mxu0 %vm47_vm0, %v38_v1 }
   0x8   :  { %15 = vsyncpa [#allocation6], 0  ;;  %1860 = vmatprep.subr.msk.mxu0 %vm47_vm0, %v37_v5  ;;  %1878 = vmatpush3.xpose.msk.msra.mxu1 %vm47_vm0, %v159_v6  ;;  %v1767_v9 = vld [vmem:[%s2399_s2 + $0x1] ss:$2 sm:$0xf]  ;;  %v158_v11 = vld [vmem:[%s2402_s5 + $0x8] sm:$0xff]  ;;  %v295_v24 = vlaneseq }
   0x9   :  { %v36_v10 = vld [vmem:[%s2400_s3 + $0x20] sm:$0xff]  ;;  %1879 = vmatprep.subr.mxu1 %v2081_v2  ;;  %v35_v13 = vld [vmem:[%s2400_s3 + $0x18] sm:$0xff]  ;;  %v34_v16 = vld [vmem:[%s2400_s3 + $0x10] sm:$0xff]  ;;  %v2084_v22 = vmov 1966171168   ;;  %vm153_vm2 = vcmask 523264  }
   0xa   :  { %281 = vperm.xlu1 %1979, %v1767_v9   ;;  %v256_v12 = vld [vmem:[%s2399_s2] ss:$2 sm:$0xf]  ;;  %v33_v17 = vld [vmem:[%s2400_s3 + $0x8] sm:$0xff]  ;;  %v293_v23 = vunpack.c.l.s4 %v2084_v22  ;;  %v2231_v29 = vshrl.u32 %v295_v24, 7  ;;  %vm316_vm3 = vcmask 130048  }
   0xb   :  { %1861 = vmatpush3.xpose.msk.msra.mxu0 %vm47_vm0, %v37_v5  ;;  %v157_v14 = vld [vmem:[%s2402_s5] sm:$0xff]  ;;  %v31_v19 = vld [vmem:[%s2398_s1 + $0x8] sm:$0xff]  ;;  %vm655_vm4 = vcmask 24576   ;;  %vm683_vm5 = vcmask 1043456   ;;  %vm679_vm6 = vcmask 31744   ;;  %s2087_s20 = smov 80  }
   0xc   :  { %1862 = vmatprep.subr.msk.mxu0 %vm47_vm0, %v36_v10  ;;  %1880 = vmatpush3.xpose.msk.msra.mxu1 %vm47_vm0, %v158_v11  ;;  %v156_v15 = vld [vmem:[%s2397_s0] sm:$0x3]  ;;  %v294_v28 = vunpack.c.0.s8 %v293_v23  ;;  %v1766_v43 = vld [vmem:[%s2399_s2 + $0x8] ss:$2 sm:$0xf]  ;;  %s2086_s2 = smov 96  }
   0xd   :  { %1881 = vmatprep.subr.mxu1 %v2081_v2  ;;  %v32_v18 = vld [vmem:[%s2400_s3] sm:$0xff]  ;;  %s2088_s21 = smov 4   ;;  %s2089_s22 = smov 8   ;;  %vm1711_vm7 = vcmask 97280   ;;  %vm1708_vm8 = vcmask 64512   ;;  %vm1683_vm9 = vcmask 1041409  }
   0xe   :  { %261 = vperm.xlu1 %1979, %v256_v12   ;;  %v1749_v25 = vld [vmem:[%s2401_s4] ss:$0 sm:$0xff]  ;;  %v297_v34 = vsub.s32 %v294_v28, %v2231_v29  ;;  %s2085_s4 = smov 112   ;;  %s2090_s23 = smov 12   ;;  %vm1719_vm10 = vcmask 123904  }
   0xf   :  { %1863 = vmatpush3.xpose.msk.msra.mxu0 %vm47_vm0, %v36_v10  ;;  %v1760_v31 = vld [vmem:[%s2403_s6] ss:$0 sm:$0xff]  ;;  %s2091_s24 = smov [#allocation5]  }
  0x10   :  { %1864 = vmatprep.subr.msk.mxu0 %vm47_vm0, %v35_v13  ;;  %1882 = vmatpush3.xpose.msk.msra.mxu1 %vm47_vm0, %v157_v14  ;;  %s1737_s25 = sshll.u32 %s2091_s24, 4  ;;  %s1738_s25 = int_to_ptr.vmem [resolvable:$true] %s1737_s25 }
  0x11   :  { %1886 = vmatprep.subr.mxu1 %v2081_v2  ;;  %s2037_s26 = scalar_lea.vmem %s1738_s25, 32  ;;  %p2042_p1 = scmp.lt.s32.totalorder %s1738_s25, %s1738_s25 }
  0x12   :  { %p2038_p0 = scmp.ne.s32.totalorder %s1738_s25, %s2037_s26  ;;  %p2043_p2 = scmp.lt.s32.totalorder %s2037_s26, %s2037_s26 }
  0x13   :  { %1865 = vmatpush3.xpose.msk.msra.mxu0 %vm47_vm0, %v35_v13  ;;  %1884 = vmatmul.mubr.msk.f32.vlgmr.msra.gmra.mxu1 %vm47_vm0, %v156_v15 }
  0x14   :  { %1866 = vmatprep.subr.msk.mxu0 %vm47_vm0, %v34_v16  ;;  %1888 = vmatprep.mubr.msk.f32.mxu1 %vm2082_vm1, %v2081_v2  ;;  %p2044_p3 = por %p2043_p2, %p2042_p1 }
  0x16   :  { %p2045_p4 = pnand %p2044_p3, %p2038_p0 }
  0x17   :  { %1867 = vmatpush3.xpose.msk.msra.mxu0 %vm47_vm0, %v34_v16 }
  0x18   :  { %1868 = vmatprep.subr.msk.mxu0 %vm47_vm0, %v33_v17 }
  0x1b   :  { %1869 = vmatpush3.xpose.msk.msra.mxu0 %vm47_vm0, %v33_v17 }
  0x1c   :  { %1870 = vmatprep.subr.msk.mxu0 %vm47_vm0, %v32_v18 }
  0x1f   :  { %1871 = vmatpush3.xpose.msk.msra.mxu0 %vm47_vm0, %v32_v18 }
  0x20   :  { %1906 = vmatprep.subr.mxu0 %v2081_v2 }
  0x22   :  { %1873 = vmatmul.mubr.msk.f32.vlgmr.msra.gmra.mxu0 %vm47_vm0, %v31_v19 }
  0x23   :  { %1908 = vmatprep.mubr.msk.f32.mxu0 %vm2082_vm1, %v2081_v2 }
  0x81   :  { %v287_v23 = vpop.permute.xlu1 %286 }
  0xd3   :  { %v249_v20 = vpop.f32.mrf.mxu1 }
  0xd4   :  { %v250_v33 = vadd.f32 %v1760_v31, %v249_v20 }
  0xd5   :  { %v1885_v21 = vpop.f32.mrf.mxu1 }
  0xd6   :  { %v298_v35 = vrot.slane %v250_v33, %v297_v34 }
  0xd8   :  { %v299_v36 = vcombine.high %v298_v35, %v298_v35  ;;  %v2237_v37 = vrot.slane %v298_v35, %v297_v34 }
  0xda   :  { %v2242_v40 = vrot.slane %v299_v36, %v297_v34 }
  0xe2   :  { %v1874_v26 = vpop.f32.mrf.mxu0 }
  0xe3   :  { %v150_v27 = vadd.f32 %v1874_v26, %v1749_v25 }
  0xe4   :  { %v144_v30 = vpop.f32.mrf.mxu0 }
  0xe5   :  { %155 = vst.msk [vmem:[#allocation2 + $0x8] sm:$0xff] %vm153_vm2, %v150_v27  ;;  %v145_v32 = vadd.f32 %v1749_v25, %v144_v30  ;;  %v282_v25 = vpop.permute.xlu1 %281 }
  0xe7   :  { %154 = vst.msk [vmem:[#allocation2] sm:$0xff] %vm153_vm2, %v145_v32  ;;  %v994_v32 = vsub.s32 0, %v2231_v29 }
  0xe9   :  { %v1076_v33 = vrot.slane %v2242_v40, %v994_v32  ;;  %v262_v35 = vpop.permute.xlu1 %261 }
  0xec   :  { %v486_v41 = vld [vmem:[#allocation2 + $0x8] sm:$0xf] }
  0xed   :  { %v315_v42 = vld [vmem:[#allocation2 + $0x8] sm:$0xf] }
  0xee   :  { %v485_v38 = vld [vmem:[#allocation2] sm:$0xf]  ;;  %v255_v28 = vld [vmem:[#allocation2 + $0x8] ss:$2 sm:$0xf] }
  0xef   :  { %v314_v39 = vld [vmem:[#allocation2] sm:$0xf]  ;;  %488 = vrot.lane.b32.xlu0 %v485_v38, %s2085_s4  ;;  %v274_v31 = vld [vmem:[#allocation2 + $0x9] ss:$2 sm:$0xf]  ;;  %v995_v38 = vrot.slane %v2237_v37, %v994_v32 }
  0xf0   :  { %1887 = vmatpush3.xpose.msk.msra.mxu1 %vm316_vm3, %v314_v39  ;;  %v272_v24 = vld [vmem:[#allocation2 + $0x1] ss:$2 sm:$0xf]  ;;  %v2288_v34 = vmul.f32 %v287_v23, %v274_v31  ;;  %v253_v36 = vld [vmem:[#allocation2] ss:$2 sm:$0xf] }
  0xf1   :  { %1891 = vmatprep.subr.mxu1 %v2081_v2  ;;  %v2280_v26 = vmul.f32 %v282_v25, %v272_v24  ;;  %v2293_v39 = vmul.f32 %v262_v35, %v253_v36  ;;  %v1172_v29 = vld [vmem:[#allocation2 + $0x4] sm:$0xf] }
  0xf3   :  { %1889 = vmatmul.mubr.msk.f32.vlgmr.msra.gmra.mxu1 %vm316_vm3, %v2237_v37  ;;  %563 = vrot.lane.b32.xlu0 %v486_v41, %s2085_s4  ;;  %v1173_v41 = vld [vmem:[#allocation2 + $0xc] sm:$0xf] }
  0xf4   :  { %1892 = vmatpush3.xpose.msk.msra.mxu1 %vm316_vm3, %v315_v42  ;;  %1893 = vmatprep.mubr.msk.f32.mxu1 %vm2082_vm1, %v2081_v2 }
  0xf5   :  { %1896 = vmatprep.subr.mxu1 %v2081_v2 }
  0xf7   :  { %1894 = vmatmul.mubr.msk.f32.vlgmr.msra.gmra.mxu1 %vm316_vm3, %v2242_v40  ;;  %266 = vperm.xlu0 %1980, %v1766_v43  }
  0xf8   :  { %1898 = vmatprep.mubr.msk.f32.mxu1 %vm2082_vm1, %v2081_v2 }
 0x161   :  { %v489_v44 = vpop.permute.xlu0 %488 }
 0x162   :  { %1897 = vmatpush3.xpose.msk.msra.mxu1 %vm316_vm3, %v489_v44 }
 0x163   :  { %1901 = vmatprep.subr.mxu1 %v2081_v2 }
 0x165   :  { %v564_v45 = vpop.permute.xlu0 %563  ;;  %1899 = vmatmul.mubr.msk.f32.vlgmr.msra.gmra.mxu1 %vm316_vm3, %v2237_v37 }
 0x166   :  { %1902 = vmatpush3.xpose.msk.msra.mxu1 %vm316_vm3, %v564_v45  ;;  %1903 = vmatprep.mubr.msk.f32.mxu1 %vm2082_vm1, %v2081_v2 }
 0x167   :  { %1911 = vmatprep.subr.mxu1 %v2081_v2 }
 0x169   :  { %1904 = vmatmul.mubr.msk.f32.vlgmr.msra.gmra.mxu1 %vm316_vm3, %v2242_v40 }
 0x16a   :  { %1913 = vmatprep.mubr.msk.f32.mxu1 %vm2082_vm1, %v2081_v2 }
 0x172   :  { %v267_v27 = vpop.permute.xlu0 %266 }
 0x173   :  { %v2283_v30 = vmul.f32 %v267_v27, %v255_v28 }
 0x1b3   :  { %v388_v46 = vpop.f32.mrf.mxu1 }
 0x1b4   :  { %v1773_v47 = vmul.f32 -1.442695, %v388_v46 }
 0x1b5   :  { %v1890_v48 = vpop.f32.mrf.mxu1 }
 0x1b6   :  { %1981 = vpow2.f32 %v1773_v47 }
 0x1b7   :  { %v463_v49 = vpop.f32.mrf.mxu1 }
 0x1b8   :  { %v1774_v50 = vmul.f32 -1.442695, %v463_v49 }
 0x1b9   :  { %v1895_v51 = vpop.f32.mrf.mxu1 }
 0x1ba   :  { %1983 = vpow2.f32 %v1774_v50 }
 0x1c3   :  { %v1982_v52 = vpop.eup %1981 }
 0x1c4   :  { %v473_v53 = vadd.f32 1.0, %v1982_v52 }
 0x1c6   :  { %1985 = vrcp.f32 %v473_v53 }
 0x1c7   :  { %v1984_v54 = vpop.eup %1983 }
 0x1c8   :  { %v474_v55 = vadd.f32 1.0, %v1984_v54 }
 0x1ca   :  { %1987 = vrcp.f32 %v474_v55 }
 0x1d3   :  { %v1986_v56 = vpop.eup %1985 }
 0x1d4   :  { %v479_v57 = vmul.f32 2.0, %v1986_v56 }
 0x1d6   :  { %v481_v58 = vmul.f32 1.442695, %v479_v57  ;;  %v990_v57 = vld [vmem:[#allocation2 + $0x4] sm:$0xf] }
 0x1d7   :  { %v1988_v59 = vpop.eup %1987 }
 0x1d8   :  { %1989 = vpow2.f32 %v481_v58  ;;  %v480_v60 = vmul.f32 2.0, %v1988_v59 }
 0x1da   :  { %v483_v61 = vmul.f32 1.442695, %v480_v60 }
 0x1dc   :  { %1991 = vpow2.f32 %v483_v61  ;;  %v991_v61 = vld [vmem:[#allocation2 + $0xc] sm:$0xf] }
 0x1e5   :  { %v2270_v62 = vpop.eup %1989 }
 0x1e6   :  { %v656_v63 = vsel %vm655_vm4, %v2270_v62, 0.0 }
 0x1e7   :  { %657 = vadd.xlane.f32.xlu0 %v656_v63 }
 0x1e9   :  { %v2274_v0 = vpop.eup %1991 }
 0x1ea   :  { %v659_v1 = vsel %vm655_vm4, %v2274_v0, 0.0 }
 0x1eb   :  { %660 = vadd.xlane.f32.xlu1 %v659_v1 }
 0x225   :  { %v558_v3 = vpop.f32.mrf.mxu1 }
 0x226   :  { %v1779_v4 = vmul.f32 -1.442695, %v558_v3 }
 0x227   :  { %v1900_v5 = vpop.f32.mrf.mxu1 }
 0x228   :  { %1993 = vpow2.f32 %v1779_v4 }
 0x229   :  { %v633_v6 = vpop.f32.mrf.mxu1 }
 0x22a   :  { %v1780_v7 = vmul.f32 -1.442695, %v633_v6 }
 0x22b   :  { %v1905_v8 = vpop.f32.mrf.mxu1 }
 0x22c   :  { %1995 = vpow2.f32 %v1780_v7 }
 0x235   :  { %v1994_v9 = vpop.eup %1993 }
 0x236   :  { %v643_v10 = vadd.f32 1.0, %v1994_v9 }
 0x238   :  { %1997 = vrcp.f32 %v643_v10 }
 0x239   :  { %v1996_v11 = vpop.eup %1995 }
 0x23a   :  { %v644_v12 = vadd.f32 1.0, %v1996_v11 }
 0x23c   :  { %1999 = vrcp.f32 %v644_v12 }
 0x245   :  { %v1998_v13 = vpop.eup %1997 }
 0x246   :  { %v649_v14 = vmul.f32 2.0, %v1998_v13 }
 0x248   :  { %v651_v15 = vmul.f32 1.442695, %v649_v14 }
 0x249   :  { %v2000_v16 = vpop.eup %1999 }
 0x24a   :  { %2001 = vpow2.f32 %v651_v15  ;;  %v650_v17 = vmul.f32 2.0, %v2000_v16 }
 0x24c   :  { %v653_v18 = vmul.f32 1.442695, %v650_v17 }
 0x24e   :  { %2003 = vpow2.f32 %v653_v18 }
 0x257   :  { %v2002_v19 = vpop.eup %2001 }
 0x258   :  { %v662_v20 = vsel %vm655_vm4, %v2002_v19, 0.0 }
 0x259   :  { %663 = vadd.xlane.f32.xlu1 %v662_v20 }
 0x25b   :  { %v2004_v21 = vpop.eup %2003 }
 0x25c   :  { %v665_v22 = vsel %vm655_vm4, %v2004_v21, 0.0 }
 0x25d   :  { %666 = vadd.xlane.f32.xlu0 %v665_v22 }
 0x26a   :  { %677 = vrot.lane.b32.xlu1 %v2280_v26, %s2086_s2 }
 0x26e   :  { %913 = vrot.lane.b32.xlu1 %v2283_v30, %s2086_s2 }
 0x270   :  { %v658_v42 = vpop.xlane.xlu0 %657 }
 0x272   :  { %1077 = vrot.lane.b32.xlu1 %v1076_v33, %s2085_s4 }
 0x273   :  { %757 = vrot.lane.b32.xlu0 %v2288_v34, %s2086_s2 }
 0x274   :  { %v661_v40 = vpop.xlane.xlu1 %660 }
 0x276   :  { %996 = vrot.lane.b32.xlu1 %v995_v38, %s2085_s4 }
 0x277   :  { %835 = vrot.lane.b32.xlu0 %v2293_v39, %s2086_s2 }
 0x27b   :  { %1250 = vrot.lane.b32.xlu0 %v1173_v41, %s2085_s4 }
 0x27f   :  { %1175 = vrot.lane.b32.xlu0 %v1172_v29, %s2085_s4 }
 0x2e2   :  { %v664_v43 = vpop.xlane.xlu1 %663 }
 0x2e3   :  { %v668_v44 = vadd.f32 %v664_v43, %v658_v42 }
 0x2e5   :  { %2005 = vrcp.f32 %v668_v44 }
 0x2e6   :  { %v667_v45 = vpop.xlane.xlu0 %666  ;;  %v678_v37 = vpop.permute.xlu1 %677 }
 0x2e7   :  { %v669_v46 = vadd.f32 %v667_v45, %v661_v40  ;;  %1907 = vmatpush3.msk.msra.mxu0 %vm683_vm5, %v678_v37 }
 0x2e8   :  { %1916 = vmatprep.subr.mxu0 %v2081_v2 }
 0x2e9   :  { %2007 = vrcp.f32 %v669_v46 }
 0x2ea   :  { %v758_v47 = vpop.permute.xlu0 %757  ;;  %v914_v48 = vpop.permute.xlu1 %913 }
 0x2eb   :  { %1912 = vmatpush3.msk.msra.mxu1 %vm683_vm5, %v758_v47 }
 0x2ec   :  { %1921 = vmatprep.subr.mxu1 %v2081_v2 }
 0x2ee   :  { %v836_v49 = vpop.permute.xlu0 %835  ;;  %v1078_v53 = vpop.permute.xlu1 %1077 }
 0x2f2   :  { %v2006_v50 = vpop.eup %2005  ;;  %v1251_v54 = vpop.permute.xlu0 %1250 }
 0x2f3   :  { %v2303_v51 = vmul.f32 %v2006_v50, %v2002_v19  ;;  %v2314_v56 = vmul.f32 %v2006_v50, %v2270_v62  ;;  %v997_v59 = vpop.permute.xlu1 %996 }
 0x2f5   :  { %1909 = vmatmul.mubr.msk.f32.vlgmr.msra.gmra.mxu0 %vm679_vm6, %v2303_v51 }
 0x2f6   :  { %v2008_v52 = vpop.eup %2007  ;;  %1917 = vmatpush3.msk.msra.mxu0 %vm683_vm5, %v836_v49  ;;  %1918 = vmatprep.mubr.msk.f32.mxu0 %vm2082_vm1, %v2081_v2  ;;  %v1176_v60 = vpop.permute.xlu0 %1175 }
 0x2f7   :  { %1926 = vmatprep.subr.mxu0 %v2081_v2  ;;  %v2311_v55 = vmul.f32 %v2008_v52, %v2004_v21  ;;  %v2327_v58 = vmul.f32 %v2008_v52, %v2274_v0 }
 0x2f9   :  { %1914 = vmatmul.mubr.msk.f32.vlgmr.msra.gmra.mxu1 %vm679_vm6, %v2311_v55  ;;  %1919 = vmatmul.mubr.msk.f32.vlgmr.msra.gmra.mxu0 %vm679_vm6, %v2314_v56 }
 0x2fa   :  { %1922 = vmatpush3.msk.msra.mxu1 %vm683_vm5, %v914_v48  ;;  %1927 = vmatpush3.xpose.msk.msra.mxu0 %vm316_vm3, %v990_v57 }
 0x2fb   :  { %1923 = vmatprep.mubr.msk.f32.mxu1 %vm2082_vm1, %v2081_v2  ;;  %1928 = vmatprep.mubr.msk.f32.mxu0 %vm2082_vm1, %v2081_v2 }
 0x2fc   :  { %1931 = vmatprep.subr.mxu1 %v2081_v2  ;;  %1936 = vmatprep.subr.mxu0 %v2081_v2 }
 0x2fd   :  { %1924 = vmatmul.mubr.msk.f32.vlgmr.msra.gmra.mxu1 %vm679_vm6, %v2327_v58  ;;  %1929 = vmatmul.mubr.msk.f32.vlgmr.msra.gmra.mxu0 %vm316_vm3, %v997_v59 }
 0x2fe   :  { %1932 = vmatpush3.xpose.msk.msra.mxu1 %vm316_vm3, %v991_v61  ;;  %1937 = vmatpush3.xpose.msk.msra.mxu0 %vm316_vm3, %v1176_v60 }
 0x2ff   :  { %1933 = vmatprep.mubr.msk.f32.mxu1 %vm2082_vm1, %v2081_v2  ;;  %1938 = vmatprep.mubr.msk.f32.mxu0 %vm2082_vm1, %v2081_v2 }
 0x300   :  { %1941 = vmatprep.subr.mxu1 %v2081_v2  ;;  %1946 = vmatprep.subr.mxu0 %v2081_v2 }
 0x301   :  { %1934 = vmatmul.mubr.msk.f32.vlgmr.msra.gmra.mxu1 %vm316_vm3, %v1078_v53  ;;  %1939 = vmatmul.mubr.msk.f32.vlgmr.msra.gmra.mxu0 %vm316_vm3, %v997_v59 }
 0x302   :  { %1942 = vmatpush3.xpose.msk.msra.mxu1 %vm316_vm3, %v1251_v54  ;;  %1943 = vmatprep.mubr.msk.f32.mxu1 %vm2082_vm1, %v2081_v2 }
 0x303   :  { %1951 = vmatprep.subr.mxu1 %v2081_v2  ;;  %1948 = vmatprep.mubr.msk.f32.mxu0 %vm2082_vm1, %v2081_v2 }
 0x305   :  { %1944 = vmatmul.mubr.msk.f32.vlgmr.msra.gmra.mxu1 %vm316_vm3, %v1078_v53 }
 0x306   :  { %1953 = vmatprep.mubr.msk.f32.mxu1 %vm2082_vm1, %v2081_v2 }
 0x3b5   :  { %v752_v62 = vpop.f32.mrf.mxu0 }
 0x3b7   :  { %v1910_v63 = vpop.f32.mrf.mxu0 }
 0x3b9   :  { %v830_v0 = vpop.f32.mrf.mxu1  ;;  %v908_v1 = vpop.f32.mrf.mxu0 }
 0x3ba   :  { %v2353_v3 = vadd.f32 %v908_v1, %v752_v62 }
 0x3bb   :  { %v1915_v4 = vpop.f32.mrf.mxu1  ;;  %v1920_v5 = vpop.f32.mrf.mxu0 }
 0x3bd   :  { %v986_v6 = vpop.f32.mrf.mxu1  ;;  %v1069_v7 = vpop.f32.mrf.mxu0 }
 0x3be   :  { %v2355_v8 = vadd.f32 %v986_v6, %v830_v0  ;;  %v1793_v9 = vmul.f32 -1.442695, %v1069_v7 }
 0x3bf   :  { %v1925_v10 = vpop.f32.mrf.mxu1  ;;  %v1930_v11 = vpop.f32.mrf.mxu0 }
 0x3c0   :  { %2009 = vpow2.f32 %v1793_v9 }
 0x3c1   :  { %v1150_v12 = vpop.f32.mrf.mxu1  ;;  %v1245_v13 = vpop.f32.mrf.mxu0 }
 0x3c2   :  { %v1794_v14 = vmul.f32 -1.442695, %v1150_v12  ;;  %v1799_v15 = vmul.f32 -1.442695, %v1245_v13 }
 0x3c3   :  { %v1935_v16 = vpop.f32.mrf.mxu1  ;;  %v1940_v17 = vpop.f32.mrf.mxu0 }
 0x3c4   :  { %2011 = vpow2.f32 %v1794_v14 }
 0x3c5   :  { %2013 = vpow2.f32 %v1799_v15  ;;  %v1320_v18 = vpop.f32.mrf.mxu1 }
 0x3c6   :  { %v1800_v19 = vmul.f32 -1.442695, %v1320_v18 }
 0x3c7   :  { %v1945_v20 = vpop.f32.mrf.mxu1 }
 0x3c8   :  { %2015 = vpow2.f32 %v1800_v19 }
 0x3cd   :  { %v2010_v21 = vpop.eup %2009 }
 0x3ce   :  { %v1160_v22 = vadd.f32 1.0, %v2010_v21 }
 0x3d0   :  { %2017 = vrcp.f32 %v1160_v22 }
 0x3d1   :  { %v2012_v23 = vpop.eup %2011 }
 0x3d2   :  { %v2014_v24 = vpop.eup %2013  ;;  %v1161_v25 = vadd.f32 1.0, %v2012_v23 }
 0x3d3   :  { %v1330_v27 = vadd.f32 1.0, %v2014_v24 }
 0x3d4   :  { %2019 = vrcp.f32 %v1161_v25 }
 0x3d5   :  { %v2016_v28 = vpop.eup %2015  ;;  %2021 = vrcp.f32 %v1330_v27 }
 0x3d6   :  { %v1331_v31 = vadd.f32 1.0, %v2016_v28 }
 0x3d8   :  { %2023 = vrcp.f32 %v1331_v31 }
 0x3dd   :  { %v2018_v32 = vpop.eup %2017 }
 0x3de   :  { %v1166_v33 = vmul.f32 2.0, %v2018_v32 }
 0x3e0   :  { %v1168_v35 = vmul.f32 1.442695, %v1166_v33 }
 0x3e1   :  { %v2020_v36 = vpop.eup %2019 }
 0x3e2   :  { %v2022_v38 = vpop.eup %2021  ;;  %2025 = vpow2.f32 %v1168_v35  ;;  %v1167_v41 = vmul.f32 2.0, %v2020_v36 }
 0x3e3   :  { %v1336_v29 = vmul.f32 2.0, %v2022_v38 }
 0x3e4   :  { %v1170_v40 = vmul.f32 1.442695, %v1167_v41 }
 0x3e5   :  { %v2024_v42 = vpop.eup %2023  ;;  %v1338_v43 = vmul.f32 1.442695, %v1336_v29 }
 0x3e6   :  { %2027 = vpow2.f32 %v1170_v40  ;;  %v1337_v44 = vmul.f32 2.0, %v2024_v42 }
 0x3e7   :  { %2029 = vpow2.f32 %v1338_v43 }
 0x3e8   :  { %v1340_v45 = vmul.f32 1.442695, %v1337_v44 }
 0x3ea   :  { %2031 = vpow2.f32 %v1340_v45 }
 0x3ef   :  { %v2026_v37 = vpop.eup %2025 }
 0x3f0   :  { %v1342_v46 = vsel %vm655_vm4, %v2026_v37, 0.0 }
 0x3f1   :  { %1343 = vadd.xlane.f32.xlu0 %v1342_v46 }
 0x3f3   :  { %v2028_v47 = vpop.eup %2027 }
 0x3f4   :  { %v1345_v48 = vsel %vm655_vm4, %v2028_v47, 0.0  ;;  %v2030_v49 = vpop.eup %2029 }
 0x3f5   :  { %1346 = vadd.xlane.f32.xlu1 %v1345_v48  ;;  %v1348_v53 = vsel %vm655_vm4, %v2030_v49, 0.0 }
 0x3f7   :  { %v2032_v50 = vpop.eup %2031 }
 0x3f8   :  { %v1351_v52 = vsel %vm655_vm4, %v2032_v50, 0.0 }
 0x3f9   :  { %1352 = vadd.xlane.f32.xlu0 %v1351_v52  ;;  %1349 = vadd.xlane.f32.xlu1 %v1348_v53 }
 0x40a   :  { %1362 = vrot.lane.b32.xlu1 %v2280_v26, %s2087_s20 }
 0x40e   :  { %1593 = vrot.lane.b32.xlu1 %v2283_v30, %s2087_s20 }
 0x40f   :  { %1439 = vrot.lane.b32.xlu0 %v2288_v34, %s2087_s20 }
 0x412   :  { %1690 = vrot.lane.b32.xlu1 %v2311_v55, %s2088_s21 }
 0x413   :  { %1516 = vrot.lane.b32.xlu0 %v2293_v39, %s2087_s20 }
 0x417   :  { %1688 = vrot.lane.b32.xlu0 %v2303_v51, %s2088_s21 }
 0x47a   :  { %v1344_v54 = vpop.xlane.xlu0 %1343 }
 0x47e   :  { %v1347_v57 = vpop.xlane.xlu1 %1346 }
 0x482   :  { %v1350_v59 = vpop.xlane.xlu1 %1349  ;;  %v1353_v60 = vpop.xlane.xlu0 %1352 }
 0x483   :  { %v1354_v61 = vadd.f32 %v1350_v59, %v1344_v54  ;;  %v1355_v62 = vadd.f32 %v1353_v60, %v1347_v57 }
 0x485   :  { %2033 = vrcp.f32 %v1354_v61 }
 0x486   :  { %2035 = vrcp.f32 %v1355_v62  ;;  %v1363_v26 = vpop.permute.xlu1 %1362  ;;  %v1440_v63 = vpop.permute.xlu0 %1439 }
 0x487   :  { %1947 = vmatpush3.msk.msra.mxu0 %vm683_vm5, %v1363_v26  ;;  %1952 = vmatpush3.msk.msra.mxu1 %vm683_vm5, %v1440_v63 }
 0x488   :  { %1956 = vmatprep.subr.mxu0 %v2081_v2  ;;  %1961 = vmatprep.subr.mxu1 %v2081_v2 }
 0x48a   :  { %v1594_v0 = vpop.permute.xlu1 %1593  ;;  %v1517_v1 = vpop.permute.xlu0 %1516 }
 0x48e   :  { %v1689_v5 = vpop.permute.xlu0 %1688  ;;  %v1691_v7 = vpop.permute.xlu1 %1690 }
 0x48f   :  { %v1707_v9 = vsel %vm679_vm6, %v2327_v58, %v1691_v7 }
 0x492   :  { %v2034_v30 = vpop.eup %2033 }
 0x493   :  { %v2036_v34 = vpop.eup %2035  ;;  %v1360_v39 = vmul.f32 %v2034_v30, %v2030_v49  ;;  %v1358_v51 = vmul.f32 %v2034_v30, %v2026_v37 }
 0x494   :  { %v1361_v55 = vmul.f32 %v2036_v34, %v2032_v50  ;;  %v1359_v4 = vmul.f32 %v2036_v34, %v2028_v47 }
 0x495   :  { %1949 = vmatmul.mubr.msk.f32.vlgmr.msra.gmra.mxu0 %vm679_vm6, %v1360_v39  ;;  %1694 = vrot.lane.b32.xlu0 %v1358_v51, %s2089_s22 }
 0x496   :  { %1702 = vrot.lane.b32.xlu1 %v1361_v55, %s2090_s23  ;;  %1954 = vmatmul.mubr.msk.f32.vlgmr.msra.gmra.mxu1 %vm679_vm6, %v1361_v55 }
 0x497   :  { %1957 = vmatpush3.msk.msra.mxu0 %vm683_vm5, %v1517_v1  ;;  %1962 = vmatpush3.msk.msra.mxu1 %vm683_vm5, %v1594_v0 }
 0x498   :  { %1958 = vmatprep.mubr.msk.f32.mxu0 %vm2082_vm1, %v2081_v2  ;;  %1963 = vmatprep.mubr.msk.f32.mxu1 %vm2082_vm1, %v2081_v2  ;;  %v1706_v2 = vsel %vm679_vm6, %v2314_v56, %v1689_v5 }
 0x499   :  { %1696 = vrot.lane.b32.xlu0 %v1359_v4, %s2089_s22  ;;  %1959 = vmatmul.mubr.msk.f32.vlgmr.msra.gmra.mxu0 %vm679_vm6, %v1358_v51 }
 0x49a   :  { %1964 = vmatmul.mubr.msk.f32.vlgmr.msra.gmra.mxu1 %vm679_vm6, %v1359_v4 }
 0x49d   :  { %1700 = vrot.lane.b32.xlu0 %v1360_v39, %s2090_s23 }
 0x507   :  { %v1695_v6 = vpop.permute.xlu0 %1694 }
 0x508   :  { %v1703_v11 = vpop.permute.xlu1 %1702  ;;  %v1709_v15 = vsel %vm1708_vm8, %v1706_v2, %v1695_v6 }
 0x50b   :  { %v1697_v10 = vpop.permute.xlu0 %1696 }
 0x50c   :  { %v1710_v12 = vsel %vm1708_vm8, %v1707_v9, %v1697_v10 }
 0x50d   :  { %v1713_v13 = vsel %vm1711_vm7, %v1710_v12, %v1703_v11 }
 0x50e   :  { %v1716_v14 = vrot.slane %v1713_v13, 7 }
 0x50f   :  { %v1701_v16 = vpop.permute.xlu0 %1700 }
 0x510   :  { %v1712_v17 = vsel %vm1711_vm7, %v1709_v15, %v1701_v16 }
 0x511   :  { %v1717_v18 = vsel %vm1683_vm9, %v1716_v14, %v1712_v17 }
 0x512   :  { %1720 = vst.msk [vmem:[#allocation5] sm:$0x3] %vm1719_vm10, %v1717_v18 }
 0x555   :  { %v1435_v19 = vpop.f32.mrf.mxu0 }
 0x556   :  { %v1512_v20 = vpop.f32.mrf.mxu1 }
 0x557   :  { %v1950_v58 = vpop.f32.mrf.mxu0 }
 0x558   :  { %v1955_v21 = vpop.f32.mrf.mxu1 }
 0x559   :  { %v1589_v22 = vpop.f32.mrf.mxu0 }
 0x55a   :  { %2048 = shalt.err (!%p2045_p4)
}
 0x55b   :  { %1740 = dma.vmem_to_hbm [thread:$0]  %s1738_s25, 32, %s2405_s8, [#allocation6]   ;;  %v1666_v56 = vpop.f32.mrf.mxu1  ;;  %v1960_v24 = vpop.f32.mrf.mxu0  ;;  %v1590_v27 = vadd.f32 %v1589_v22, %v1435_v19  ;;  %vm1686_vm11 = vcmask 254976  }
 0x55c   :  { %v1667_v23 = vadd.f32 %v1666_v56, %v1512_v20  ;;  %s2092_s29 = smov 16   ;;  %s2093_s30 = smov [#allocation3]  }
 0x55d   :  { %v1965_v25 = vpop.f32.mrf.mxu1  ;;  %s1727_s9 = sshll.u32 %s2093_s30, 4  ;;  %s1728_s9 = int_to_ptr.vmem [resolvable:$true] %s1727_s9 }
 0x55e   :  { %1674 = vrot.lane.b32.xlu1 %v1667_v23, %s2092_s29  ;;  %s2057_s8 = scalar_lea.vmem %s1728_s9, 32  ;;  %p2062_p6 = scmp.lt.s32.totalorder %s1728_s9, %s1728_s9 }
 0x55f   :  { %p2058_p5 = scmp.ne.s32.totalorder %s1728_s9, %s2057_s8  ;;  %p2063_p7 = scmp.lt.s32.totalorder %s2057_s8, %s2057_s8 }
 0x561   :  { %p2064_p8 = por %p2063_p7, %p2062_p6 }
 0x562   :  { %1672 = vrot.lane.b32.xlu1 %v1590_v27, %s2092_s29 }
 0x563   :  { %p2065_p9 = pnand %p2064_p8, %p2058_p5 }
 0x5d0   :  { %v1675_v28 = vpop.permute.xlu1 %1674 }
 0x5d1   :  { %v1679_v31 = vsel %vm316_vm3, %v2355_v8, %v1675_v28 }
 0x5d2   :  { %v1682_v32 = vrot.slane %v1679_v31, 7 }
 0x5d4   :  { %v1673_v33 = vpop.permute.xlu1 %1672 }
 0x5d5   :  { %v1678_v35 = vsel %vm316_vm3, %v2353_v3, %v1673_v33 }
 0x5d6   :  { %v1684_v36 = vsel %vm1683_vm9, %v1682_v32, %v1678_v35 }
 0x5d7   :  { %1687 = vst.msk [vmem:[#allocation3] sm:$0x3] %vm1686_vm11, %v1684_v36 }
 0x5d8   :  { %2068 = shalt.err (!%p2065_p9)
}
 0x5d9   :  { %1730 = dma.vmem_to_hbm [thread:$0]  %s1728_s9, 32, %s2404_s7, [#allocation4]  }
 0x5da   :  { %2077 = dma.done.wait [#allocation4], 32  }
 0x5db   :  { %2078 = vsyncadd [#allocation4], 4294967264 }
 0x5dc   :  { %2079 = dma.done.wait [#allocation6], 32  }
 0x5dd   :  { %2080 = vsyncadd [#allocation6], 4294967264 }
 0x5de   :  { %1747 = vsyncpa [#allocation4], 1 }
 0x5df   :  { %1748 = vsyncpa [#allocation6], 1 }

</bundles_post_ra>
